<compile_context>
chip_gen: v5e
topology: v5e:2x2
jax: 0.10.0
libtpu: 0.0.40
codegen_flags: <defaults>
</compile_context>

<pallas_src>
import jax
import jax.numpy as jnp
from jax.experimental import pallas as pl
from jax.experimental.pallas import tpu as pltpu


def _pick_row_tile(hw, max_tile=4096):
    """Largest lane tile (multiple of 128 dividing hw) up to max_tile, else full hw."""
    if hw <= max_tile:
        return hw
    t = max_tile - (max_tile % 128)
    while t >= 128:
        if hw % t == 0:
            return t
        t -= 128
    # No 128-aligned divisor: fall back to the full extent (block == full array
    # dim, which Pallas accepts; stores become masked but remain correct).
    return hw


# ----------------------------------------------------------------------------
# Pallas kernel: one (row-tile, episode) per grid step.
# Layout: channels on sublanes, pixels (HW) on lanes -> lane-dense stores and
# zero layout transposes on the image / init / output paths.
# ----------------------------------------------------------------------------
def _context_kernel(x_ref, cam_ref, w1bd_ref, w2k_ref, kb2_ref, init_ref, o_ref):
    # x_ref   : (1, K*Cin, THW)  image pixels, one episode / row tile
    # cam_ref : (1, K*C1, 1)     per-frame camera term  cameras @ w1_cam + b1
    # w1bd_ref: (K*C1, K*Cin)    block-diagonal W1_img^T (one block per frame)
    # w2k_ref : (C_hid, K*C1)    W2^T tiled K times along the contraction
    # kb2_ref : (C_hid, 1)       K * b2            (pre-scaled if use_mean)
    # init_ref: (C_hid, THW)     init representation row tile (pre-scaled if mean)
    # o_ref   : (1, C_hid, THW)  pooled representation row tile

    # First 1x1 conv of all K frames in one MXU pass: the block-diagonal W1^T
    # keeps each frame's Cin channels multiplying only its own C1 output rows.
    h = jnp.dot(w1bd_ref[...], x_ref[0],
                preferred_element_type=jnp.float32)          # (K*C1, THW) f32
    # Camera/bias add + ReLU stay in f32 on the VPU (v5e has no bf16 VPU).
    h = jnp.maximum(h + cam_ref[0], 0.0)
    # Second 1x1 conv with the K-frame sum folded into the contraction
    # (W2^T tiled K times): a single 256-deep matmul, bf16 MXU operands.
    r = jnp.dot(w2k_ref[...], h.astype(w2k_ref.dtype),
                preferred_element_type=jnp.float32)          # (C_hid, THW) f32
    o_ref[0] = (r + kb2_ref[...] + init_ref[...]).astype(o_ref.dtype)


# ----------------------------------------------------------------------------
# Wrapper: free reshapes + tiny host-side weight folding + pallas_call.
# ----------------------------------------------------------------------------
def context_network_forward(images, cameras, params, *, use_mean=False,
                            compute_dtype=jnp.bfloat16, out_dtype=jnp.float32):
    """
    images : (E, K, Cin, H, W)  float32 NCHW frames
    cameras: (E, K, P)          float32 camera poses
    params : w1 (Cin+P, C1), b1 (C1,), w2 (C1, C_hid), b2 (C_hid,),
             init_rep (1, C_hid, H, W)
    returns: (E, C_hid, H, W)   NCHW, matching the PyTorch module output
    """
    E, K, Cin, H, W = images.shape
    HW = H * W
    C1 = params["w1"].shape[1]
    C_hid = params["w2"].shape[1]

    init_full = params["init_rep"].reshape(C_hid, HW).astype(jnp.float32)

    if K == 0:
        # PyTorch `image is None` path: the representation is just the init
        # representation (sum/mean over a single element is the identity).
        rep = jnp.broadcast_to(init_full.reshape(1, C_hid, H, W),
                               (E, C_hid, H, W))
        return rep.astype(out_dtype)
    # TODO(synk): episodes with *mixed* empty / non-empty contexts inside one
    # batch (per-episode `if image is None`) are Python-level control flow not
    # expressible in this fixed-shape kernel.

    THW = _pick_row_tile(HW)
    n_tiles = HW // THW
    scale = 1.0 / float(K + 1) if use_mean else 1.0

    # NCHW flattened over (K, Cin) and (H, W): channels on sublanes, pixels on
    # lanes, one contiguous (K*Cin, HW) slab per episode -- free reshape.
    x = images.reshape(E, K * Cin, HW).astype(compute_dtype)

    # Split W1 into image / camera parts.  The camera + b1 contribution is a
    # tiny (E, K*C1, 1) tensor computed host-side (no spatial broadcast).
    w1_img = params["w1"][:Cin]                               # (Cin, C1)
    w1_cam = params["w1"][Cin:]                               # (P,  C1)
    cam_term = jnp.matmul(cameras, w1_cam,
                          precision=jax.lax.Precision.HIGHEST)
    cam_term = cam_term + params["b1"][None, None, :]
    cam_term = cam_term.reshape(E, K * C1, 1).astype(jnp.float32)

    # Block-diagonal W1_img^T: frame k's Cin columns feed its own C1 rows.
    w1t = jnp.transpose(w1_img)                               # (C1, Cin)
    w1bd = jnp.kron(jnp.eye(K, dtype=w1t.dtype), w1t)         # (K*C1, K*Cin)
    w1bd = w1bd.astype(compute_dtype)

    # W2^T tiled K times along the contraction folds the K-frame sum into the
    # second matmul; use_mean's 1/(K+1) is folded into w2/b2/init (weights).
    w2k = jnp.tile(jnp.transpose(params["w2"]) * scale, (1, K))
    w2k = w2k.astype(compute_dtype)                           # (C_hid, K*C1)
    kb2 = (float(K) * scale * params["b2"]).reshape(C_hid, 1).astype(jnp.float32)
    init = (scale * init_full).astype(jnp.float32)            # (C_hid, HW)

    # Grid: row-tile axis leading, episode axis innermost so the init block
    # index is constant along the fastest-varying axis (DMA'd once per tile).
    # If HW fits in one tile, swap so the leading parallel axis is E (v7x).
    if n_tiles >= 2:
        grid = (n_tiles, E)
        img_map = lambda p, e: (e, 0, p)
        cam_map = lambda p, e: (e, 0, 0)
        mat_map = lambda p, e: (0, 0)
        init_map = lambda p, e: (0, p)
        out_map = lambda p, e: (e, 0, p)
    else:
        grid = (E, n_tiles)
        img_map = lambda e, p: (e, 0, p)
        cam_map = lambda e, p: (e, 0, 0)
        mat_map = lambda e, p: (0, 0)
        init_map = lambda e, p: (0, p)
        out_map = lambda e, p: (e, 0, p)

    out = pl.pallas_call(
        _context_kernel,
        out_shape=jax.ShapeDtypeStruct((E, C_hid, HW), out_dtype),
        grid=grid,
        in_specs=[
            pl.BlockSpec((1, K * Cin, THW), img_map),
            pl.BlockSpec((1, K * C1, 1), cam_map),
            pl.BlockSpec((K * C1, K * Cin), mat_map),
            pl.BlockSpec((C_hid, K * C1), mat_map),
            pl.BlockSpec((C_hid, 1), mat_map),
            pl.BlockSpec((C_hid, THW), init_map),
        ],
        out_specs=pl.BlockSpec((1, C_hid, THW), out_map),
        compiler_params=pltpu.CompilerParams(
            dimension_semantics=("parallel", "parallel")),
    )(x, cam_term, w1bd, w2k, kb2, init)

    # (E, C_hid, HW) is already NCHW-flat: reshape only, no transpose.
    return out.reshape(E, C_hid, H, W)


# ----------------------------------------------------------------------------
# Pure-JAX reference (mirrors the PyTorch forward, for verification).
# ----------------------------------------------------------------------------
def _reference(images, cameras, params, *, use_mean=False):
    E, K, Cin, H, W = images.shape
    P = cameras.shape[-1]
    hp = jax.lax.Precision.HIGHEST
    img = jnp.transpose(images, (0, 1, 3, 4, 2)).reshape(E, K * H * W, Cin)
    cam = jnp.broadcast_to(cameras[:, :, None, :], (E, K, H * W, P)).reshape(
        E, K * H * W, P)
    x = jnp.concatenate([img, cam], axis=-1)
    h = jnp.maximum(jnp.matmul(x, params["w1"], precision=hp) + params["b1"], 0.0)
    r = jnp.matmul(h, params["w2"], precision=hp) + params["b2"]    # (E, K*HW, C)
    C_hid = r.shape[-1]
    r = r.reshape(E, K, H * W, C_hid)
    init = jnp.transpose(params["init_rep"][0], (1, 2, 0)).reshape(H * W, C_hid)
    rep = r.sum(axis=1) + init[None]
    if use_mean:
        rep = rep / (K + 1)
    return jnp.transpose(rep.reshape(E, H, W, C_hid), (0, 3, 1, 2))


# ----------------------------------------------------------------------------
# Main: deterministic synthetic parameters + inputs.
# ----------------------------------------------------------------------------
if __name__ == "__main__":
    E, K = 2, 4            # episodes, context frames per episode
    Cin, H, W = 3, 16, 16  # image channels / spatial size
    P = 7                  # camera pose dim (GQN convention)
    C1, C_hid = 64, 32     # repnet hidden width / output channels (num_hidden)

    key = jax.random.PRNGKey(0)
    k_img, k_cam, k_w1, k_b1, k_w2, k_b2, k_init = jax.random.split(key, 7)

    images = jax.random.normal(k_img, (E, K, Cin, H, W), jnp.float32)
    cameras = jax.random.normal(k_cam, (E, K, P), jnp.float32)

    params = {
        "w1": jax.random.normal(k_w1, (Cin + P, C1), jnp.float32) * 0.1,
        "b1": jax.random.normal(k_b1, (C1,), jnp.float32) * 0.1,
        "w2": jax.random.normal(k_w2, (C1, C_hid), jnp.float32) * 0.1,
        "b2": jax.random.normal(k_b2, (C_hid,), jnp.float32) * 0.1,
        # nonzero to exercise the (trained) init-representation add path
        "init_rep": jax.random.normal(k_init, (1, C_hid, H, W), jnp.float32) * 0.1,
    }

    ok = True
    for use_mean in (False, True):
        ref = _reference(images, cameras, params, use_mean=use_mean)

        # f32 operands: tight tolerance.
        out32 = context_network_forward(images, cameras, params,
                                        use_mean=use_mean,
                                        compute_dtype=jnp.float32)
        out32 = jax.block_until_ready(out32)
        ok &= out32.shape == (E, C_hid, H, W)
        ok &= bool(jnp.allclose(out32, ref, atol=1e-4, rtol=1e-4))

        # bf16 operands / f32 MXU accumulation (default): loosened tolerance
        # (the wrapper quantizes the images themselves to bf16).
        out16 = context_network_forward(images, cameras, params,
                                        use_mean=use_mean)
        out16 = jax.block_until_ready(out16)
        ok &= out16.shape == (E, C_hid, H, W)
        ok &= bool(jnp.allclose(out16, ref, atol=5e-2, rtol=5e-2))

    # Empty-context path (PyTorch `image is None`): result == init representation.
    out_empty = context_network_forward(images[:, :0], cameras[:, :0], params)
    out_empty = jax.block_until_ready(out_empty)
    init_b = jnp.broadcast_to(params["init_rep"], (E, C_hid, H, W))
    ok &= out_empty.shape == (E, C_hid, H, W)
    ok &= bool(jnp.allclose(out_empty, init_b, atol=1e-6))

    if ok:
        print("KERNEL_OK")
    else:
        print("MISMATCH")
</pallas_src>

<mosaic_0001>
module attributes {stable_mosaic.version = 11 : i64} {
  func.func @_context_kernel(%arg0: i32, %arg1: i32, %arg2: memref<1x12x256xf32, #tpu.memory_space<vmem>>, %arg3: memref<1x256x1xf32, #tpu.memory_space<vmem>>, %arg4: memref<256x12xf32, #tpu.memory_space<vmem>>, %arg5: memref<32x256xf32, #tpu.memory_space<vmem>>, %arg6: memref<32x1xf32, #tpu.memory_space<vmem>>, %arg7: memref<32x256xf32, #tpu.memory_space<vmem>>, %arg8: memref<1x32x256xf32, #tpu.memory_space<vmem>>) attributes {dimension_semantics = [#tpu.dimension_semantics<parallel>, #tpu.dimension_semantics<parallel>], iteration_bounds = array<i64: 2, 1>, scalar_prefetch = 0 : i64, scratch_operands = 0 : i64, tpu.core_type = #tpu.core_type<tc>, window_params = [{transform_indices = @transform_0, window_bounds = array<i64: 1, 12, 256>}, {transform_indices = @transform_1, window_bounds = array<i64: 1, 256, 1>}, {pipeline_mode = #tpu.pipeline_mode<synchronous>, transform_indices = @transform_2, window_bounds = array<i64: 256, 12>}, {pipeline_mode = #tpu.pipeline_mode<synchronous>, transform_indices = @transform_3, window_bounds = array<i64: 32, 256>}, {pipeline_mode = #tpu.pipeline_mode<synchronous>, transform_indices = @transform_4, window_bounds = array<i64: 32, 1>}, {transform_indices = @transform_5, window_bounds = array<i64: 32, 256>}, {transform_indices = @transform_6, window_bounds = array<i64: 1, 32, 256>}]} {
    %c0 = arith.constant 0 : index
    %c0_0 = arith.constant 0 : index
    %0 = vector.load %arg4[%c0, %c0_0] : memref<256x12xf32, #tpu.memory_space<vmem>>, vector<256x12xf32>
    %c0_1 = arith.constant 0 : index
    %c0_2 = arith.constant 0 : index
    %c0_3 = arith.constant 0 : index
    %1 = vector.load %arg2[%c0_1, %c0_2, %c0_3] : memref<1x12x256xf32, #tpu.memory_space<vmem>>, vector<1x12x256xf32>
    %2 = vector.shape_cast %1 : vector<1x12x256xf32> to vector<12x256xf32>
    %cst = arith.constant dense<0.000000e+00> : vector<256x256xf32>
    %3 = tpu.matmul %0, %2, %cst {dimension_numbers = #tpu.dot_dimension_numbers<[1], [0], [0], [1], [0, 0, 1, 1], [], []>} : vector<256x12xf32>, vector<12x256xf32>, vector<256x256xf32> -> vector<256x256xf32>
    %c0_4 = arith.constant 0 : index
    %c0_5 = arith.constant 0 : index
    %c0_6 = arith.constant 0 : index
    %4 = vector.load %arg3[%c0_4, %c0_5, %c0_6] : memref<1x256x1xf32, #tpu.memory_space<vmem>>, vector<1x256x1xf32>
    %5 = vector.shape_cast %4 : vector<1x256x1xf32> to vector<256x1xf32>
    %6 = vector.broadcast %5 : vector<256x1xf32> to vector<256x256xf32>
    %7 = arith.addf %3, %6 : vector<256x256xf32>
    %cst_7 = arith.constant 0.000000e+00 : f32
    %8 = vector.broadcast %cst_7 : f32 to vector<256x256xf32>
    %9 = arith.maximumf %7, %8 : vector<256x256xf32>
    %c0_8 = arith.constant 0 : index
    %c0_9 = arith.constant 0 : index
    %10 = vector.load %arg5[%c0_8, %c0_9] : memref<32x256xf32, #tpu.memory_space<vmem>>, vector<32x256xf32>
    %cst_10 = arith.constant dense<0.000000e+00> : vector<32x256xf32>
    %11 = tpu.matmul %10, %9, %cst_10 {dimension_numbers = #tpu.dot_dimension_numbers<[1], [0], [0], [1], [0, 0, 1, 1], [], []>} : vector<32x256xf32>, vector<256x256xf32>, vector<32x256xf32> -> vector<32x256xf32>
    %c0_11 = arith.constant 0 : index
    %c0_12 = arith.constant 0 : index
    %12 = vector.load %arg6[%c0_11, %c0_12] : memref<32x1xf32, #tpu.memory_space<vmem>>, vector<32x1xf32>
    %13 = vector.broadcast %12 : vector<32x1xf32> to vector<32x256xf32>
    %14 = arith.addf %11, %13 : vector<32x256xf32>
    %c0_13 = arith.constant 0 : index
    %c0_14 = arith.constant 0 : index
    %15 = vector.load %arg7[%c0_13, %c0_14] : memref<32x256xf32, #tpu.memory_space<vmem>>, vector<32x256xf32>
    %16 = arith.addf %14, %15 : vector<32x256xf32>
    %c0_15 = arith.constant 0 : index
    %c0_16 = arith.constant 0 : index
    %c0_17 = arith.constant 0 : index
    %17 = vector.load %arg8[%c0_15, %c0_16, %c0_17] : memref<1x32x256xf32, #tpu.memory_space<vmem>>, vector<1x32x256xf32>
    %18 = vector.shape_cast %17 : vector<1x32x256xf32> to vector<32x256xf32>
    %19 = vector.shape_cast %16 : vector<32x256xf32> to vector<1x32x256xf32>
    tpu.vector_store %arg8[%c0_15, %c0_16, %c0_17], %19 {strides = array<i32>} : memref<1x32x256xf32, #tpu.memory_space<vmem>>, vector<1x32x256xf32>,
    return
  }
  func.func @transform_0(%arg0: i32, %arg1: i32) -> (i32, i32, i32) {
    %c0_i32 = arith.constant 0 : i32
    %c0_i32_0 = arith.constant 0 : i32
    return %arg0, %c0_i32, %arg1 : i32, i32, i32
  }
  func.func @transform_1(%arg0: i32, %arg1: i32) -> (i32, i32, i32) {
    %c0_i32 = arith.constant 0 : i32
    %c0_i32_0 = arith.constant 0 : i32
    %c0_i32_1 = arith.constant 0 : i32
    return %arg0, %c0_i32, %c0_i32_0 : i32, i32, i32
  }
  func.func @transform_2(%arg0: i32, %arg1: i32) -> (i32, i32) {
    %c0_i32 = arith.constant 0 : i32
    %c0_i32_0 = arith.constant 0 : i32
    %c0_i32_1 = arith.constant 0 : i32
    return %c0_i32, %c0_i32_0 : i32, i32
  }
  func.func @transform_3(%arg0: i32, %arg1: i32) -> (i32, i32) {
    %c0_i32 = arith.constant 0 : i32
    %c0_i32_0 = arith.constant 0 : i32
    %c0_i32_1 = arith.constant 0 : i32
    return %c0_i32, %c0_i32_0 : i32, i32
  }
  func.func @transform_4(%arg0: i32, %arg1: i32) -> (i32, i32) {
    %c0_i32 = arith.constant 0 : i32
    %c0_i32_0 = arith.constant 0 : i32
    %c0_i32_1 = arith.constant 0 : i32
    return %c0_i32, %c0_i32_0 : i32, i32
  }
  func.func @transform_5(%arg0: i32, %arg1: i32) -> (i32, i32) {
    %c0_i32 = arith.constant 0 : i32
    %c0_i32_0 = arith.constant 0 : i32
    return %c0_i32, %arg1 : i32, i32
  }
  func.func @transform_6(%arg0: i32, %arg1: i32) -> (i32, i32, i32) {
    %c0_i32 = arith.constant 0 : i32
    %c0_i32_0 = arith.constant 0 : i32
    return %arg0, %c0_i32, %arg1 : i32, i32, i32
  }
}

</mosaic_0001>

<bundles_post_ra>
// kernel: tpu_custom_call.1
= control target key start
LH: loop header
LB: loop body
LE: loop exit
PB: predicated region body
PF: predicated region fallthrough
CT: control target
= control target key end

     0   :  { %11 = vsyncpa [#allocation3], 0  ;;  %s2138_s0 = inlined_call_operand.vmem [shape: f32[2,12,256], index: 0, kind: input, shape index: {}]   ;;  %s2139_s1 = inlined_call_operand.vmem [shape: f32[2,256,1], index: 1, kind: input, shape index: {}]   ;;  %s2140_s2 = inlined_call_operand.vmem [shape: f32[256,12], index: 2, kind: input, shape index: {}]   ;;  %s2141_s3 = inlined_call_operand.vmem [shape: f32[32,256], index: 3, kind: input, shape index: {}]   ;;  %s2142_s4 = inlined_call_operand.vmem [shape: f32[32,1], index: 4, kind: input, shape index: {}]   ;;  %s2143_s5 = inlined_call_operand.vmem [shape: f32[32,256], index: 5, kind: input, shape index: {}]   ;;  %s2144_s6 = inlined_call_operand.hbm [shape: f32[2,32,256], index: 6, kind: output, shape index: {}]  }
   0x1   :  { %13 = vsyncpa [#allocation3 + $0x1], 0  ;;  %s1509_s21 = smov 0   ;;  %s1511_s22 = smov 0  }
   0x2   :  { %s1513_s23 = smov 0   ;;  %s1515_s24 = smov 0  }
   0x3   :  { %s1517_s25 = smov 0   ;;  %s1519_s26 = smov 0  }
   0x4 LB: > { %s1241_s27 = sadd.s32 4294967295, %s1469_s26   ;;  %s1242_s28 = sadd.s32 4294967294, %s1469_s26   ;;  %s1469_s26 = sphi %s1519_s26, %s19_s26   ;;  %s1465_s25 = sphi %s1517_s25, %s2167_s25   ;;  %s1461_s24 = sphi %s1515_s24, %s2166_s24   ;;  %s1457_s23 = sphi %s1513_s23, %s2165_s23   ;;  %s1453_s22 = sphi %s1511_s22, %s2164_s22   ;;  %s1449_s21 = sphi %s1509_s21, %s2163_s21  }
   0x5   : > { %s31_s29 = sadd.s32 1, %s1465_s25  ;;  %s183_s30 = sadd.s32 1, %s1457_s23 }
   0x6   : > { %p33_p0 = scmp.ge.s32.totalorder %s31_s29, 2  ;;  %p193_p1 = scmp.ne.s32.totalorder %s1457_s23, %s1453_s22 }
   0x7   : > { %p194_p2 = scmp.eq.s32.totalorder %s1241_s27, 1  ;;  %p199_p3 = scmp.ne.s32.totalorder %s1453_s22, %s1449_s21 }
   0x8   : > { %s2169_s29 = smov (%p33_p0, %s31_s29), 0  ;;  %p200_p5 = scmp.eq.s32.totalorder %s1242_s28, 1 }
   0x9   : > { %p1549_p4 = por %p194_p2, %p193_p1  ;;  %s178_s8 = ssub.s32 %s1465_s25, %s2169_s29 }
   0xa   : > { %p1246_p6 = scmp.ge.s32.totalorder %s1469_s26, 1  ;;  %p181_p7 = scmp.eq.s32.totalorder %s178_s8, 0 }
   0xb   : > { %p1556_p8 = por %p200_p5, %p199_p3  ;;  %p257_p9 = scmp.lt.s32.totalorder %s1469_s26, 3 }
   0xc   : > { %s1562_s10 = scalar_select %p181_p7, %s1457_s23, %s183_s30  }
   0xd   : > { %p258_p10 = pnand %p1246_p6, %p257_p9 }
   0xf   : > { %261 = sbr.rel (%p258_p10) target bundleno = 527 (0x20f), region = 44 }
  0x14   : > { %p302_p11 = scmp.lt.s32.totalorder %s1461_s24, 1  ;;  %v1471_v0 = vmov 0   ;;  %vm648_vm0 = vcmask 1043456   ;;  %v323_v8 = vld [vmem:[%s2140_s2] sm:$0xff]  ;;  %vm551_vm1 = vcmask 97280   ;;  %v344_v9 = vld [vmem:[%s2140_s2 + $0xa8] sm:$0xff] }
  0x15   : > { %1390 = vset.pattern.permute.xlu2 %v1471_v0  ;;  %1389 = vset.pattern.permute.xlu1 %v1471_v0  ;;  %v1590_v10 = vld [vmem:[%s2140_s2 + $0xa0] sm:$0xff]  ;;  %v324_v14 = vld [vmem:[%s2140_s2 + $0x8] sm:$0xff]  ;;  %v345_v15 = vld [vmem:[%s2140_s2 + $0xb0] sm:$0xff]  ;;  %s1325_s18 = sshll.u32 %s1461_s24, 6 }
  0x16   : > { %1388 = vset.pattern.permute.xlu0 %v1471_v0  ;;  %s303_s11 = scalar_select %p302_p11, %s1461_s24, 1  ;;  %v325_v19 = vld [vmem:[%s2140_s2 + $0x10] sm:$0xff]  ;;  %v346_v20 = vld [vmem:[%s2140_s2 + $0xb8] sm:$0xff]  ;;  %v347_v25 = vld [vmem:[%s2140_s2 + $0xc0] sm:$0xff] }
  0x17   : > { %v326_v24 = vld [vmem:[%s2140_s2 + $0x18] sm:$0xff]  ;;  %v327_v29 = vld [vmem:[%s2140_s2 + $0x20] sm:$0xff]  ;;  %v348_v30 = vld [vmem:[%s2140_s2 + $0xc8] sm:$0xff]  ;;  %s1131_s27 = scalar_lea.hbm %s2144_s6, %s1325_s18  ;;  %s1411_s18 = scalar_lea.hbm %s2144_s6, 128 }
  0x18   : > { %s1324_s12 = sshll.u32 %s303_s11, 8  ;;  %s1323_s13 = sshll.u32 %s303_s11, 5  ;;  %v328_v34 = vld [vmem:[%s2140_s2 + $0x28] sm:$0xff]  ;;  %v349_v35 = vld [vmem:[%s2140_s2 + $0xd0] sm:$0xff]  ;;  %v350_v40 = vld [vmem:[%s2140_s2 + $0xd8] sm:$0xff] }
  0x19   : > { %s1569_s16 = scalar_lea.vmem %s2139_s1, %s1324_s12  ;;  %s309_s19 = scalar_lea.vmem %s2138_s0, %s1323_s13  ;;  %v329_v39 = vld [vmem:[%s2140_s2 + $0x30] sm:$0xff]  ;;  %v330_v44 = vld [vmem:[%s2140_s2 + $0x38] sm:$0xff]  ;;  %v351_v45 = vld [vmem:[%s2140_s2 + $0xe0] sm:$0xff] }
  0x1a   : > { %v390_v1 = vld [vmem:[%s1569_s16 + $0xf8] sm:$0xff]  ;;  %v389_v2 = vld [vmem:[%s1569_s16 + $0xf0] sm:$0xff]  ;;  %v355_v6 = vld [vmem:[%s309_s19] sm:$0xff]  ;;  %s298_s13 = sand.u32 1, %s1453_s22   ;;  %s1134_s11 = sshll.u32 %s1131_s27, 4  ;;  %s1135_s11 = int_to_ptr.hbm [resolvable:$true] %s1134_s11 }
  0x1b   : > { %v374_v3 = vld [vmem:[%s1569_s16 + $0x78] sm:$0xff]  ;;  %548 = vperm.xlu1 %1389, %v390_v1   ;;  %543 = vperm.xlu2 %1390, %v389_v2   ;;  %v357_v4 = vld [vmem:[%s309_s19 + $0x10] sm:$0xf]  ;;  %v356_v7 = vld [vmem:[%s309_s19 + $0x8] sm:$0xff]  ;;  %s1247_s14 = sshll.u32 %s298_s13, 6  ;;  %s1118_s24 = scalar_lea.sflag [#allocation3], %s298_s13 }
  0x1c   : > { %v358_v5 = vld [vmem:[%s309_s19 + $0x18] sm:$0xf]  ;;  %468 = vperm.xlu0 %1388, %v374_v3   ;;  %1252 = vmatpush.msk.msra.mxu0 %vm648_vm0, %v357_v4  ;;  %v372_v11 = vld [vmem:[%s1569_s16 + $0x68] sm:$0xff]  ;;  %v371_v12 = vld [vmem:[%s1569_s16 + $0x60] sm:$0xff]  ;;  %s2068_s17 = scalar_lea.vmem [#allocation2], %s1247_s14  ;;  %s1405_s12 = sshra.s32 %s1135_s11, 4  ;;  %s1406_s12 = int_to_ptr.hbm [resolvable:$true] %s1405_s12 }
  0x1d   : > { %1326 = vmatpush.msk.msra.mxu2 %vm648_vm0, %v357_v4  ;;  %1285 = vmatpush.msk.msra.mxu1 %vm648_vm0, %v358_v5  ;;  %v373_v13 = vld [vmem:[%s1569_s16 + $0x70] sm:$0xff]  ;;  %v387_v16 = vld [vmem:[%s1569_s16 + $0xe0] sm:$0xff]  ;;  %v370_v17 = vld [vmem:[%s1569_s16 + $0x58] sm:$0xff]  ;;  %s1132_s28 = sshll.u32 %s2068_s17, 4  ;;  %s1407_s14 = scalar_lea.hbm %s1406_s12, 64  ;;  %s1133_s28 = int_to_ptr.vmem [resolvable:$true] %s1132_s28 }
  0x1e   : > { %670 = vmatpush.msra.mxu0 %v355_v6  ;;  %1328 = vmatpush.msk.msra.mxu3 %vm648_vm0, %v358_v5  ;;  %v388_v18 = vld [vmem:[%s1569_s16 + $0xe8] sm:$0xff]  ;;  %v386_v21 = vld [vmem:[%s1569_s16 + $0xd8] sm:$0xff]  ;;  %v369_v23 = vld [vmem:[%s1569_s16 + $0x50] sm:$0xff]  ;;  %p1408_p12 = scmp.ne.s32.totalorder %s1406_s12, %s1407_s14  ;;  %p1412_p1 = scmp.lt.s32.totalorder %s1406_s12, %s2144_s6 }
  0x1f   : > { %1327 = vmatpush.msra.mxu2 %v355_v6  ;;  %783 = vmatpush.msra.mxu1 %v356_v7  ;;  %v368_v22 = vld [vmem:[%s1569_s16 + $0x48] sm:$0xff]  ;;  %v367_v27 = vld [vmem:[%s1569_s16 + $0x40] sm:$0xff]  ;;  %v385_v28 = vld [vmem:[%s1569_s16 + $0xd0] sm:$0xff]  ;;  %p1413_p2 = scmp.lt.s32.totalorder %s1411_s18, %s1407_s14 }
  0x20   : > { %1253 = vmatmul.msk.f32.vlgmr.msra.gmra.mxu0 %vm551_vm1, %v323_v8  ;;  %1274 = vmatmul.msk.f32.vlgmr.msra.gmra.mxu2 %vm551_vm1, %v344_v9  ;;  %v384_v26 = vld [vmem:[%s1569_s16 + $0xc8] sm:$0xff]  ;;  %v383_v31 = vld [vmem:[%s1569_s16 + $0xc0] sm:$0xff]  ;;  %v365_v32 = vld [vmem:[%s1569_s16 + $0x30] sm:$0xff]  ;;  %p1409_p13 = pnand %p1408_p12, %p1549_p4 }
  0x21   : > { %1286 = vmatmul.msk.f32.vlgmr.msra.gmra.mxu1 %vm551_vm1, %v323_v8  ;;  %1329 = vmatpush.msra.mxu3 %v356_v7  ;;  %v366_v33 = vld [vmem:[%s1569_s16 + $0x38] sm:$0xff]  ;;  %v381_v36 = vld [vmem:[%s1569_s16 + $0xb0] sm:$0xff]  ;;  %v364_v37 = vld [vmem:[%s1569_s16 + $0x28] sm:$0xff]  ;;  %p1414_p3 = por %p1413_p2, %p1412_p1 }
  0x22   : > { %1306 = vmatmul.msk.f32.vlgmr.msra.gmra.mxu3 %vm551_vm1, %v1590_v10  ;;  %v382_v38 = vld [vmem:[%s1569_s16 + $0xb8] sm:$0xff]  ;;  %v380_v41 = vld [vmem:[%s1569_s16 + $0xa8] sm:$0xff]  ;;  %v363_v43 = vld [vmem:[%s1569_s16 + $0x20] sm:$0xff]  ;;  %p1410_p0 = pneg %p1409_p13 }
  0x23   : > { %458 = vperm.xlu1 %1389, %v372_v11   ;;  %453 = vperm.xlu2 %1390, %v371_v12   ;;  %v362_v42 = vld [vmem:[%s1569_s16 + $0x18] sm:$0xff]  ;;  %v361_v47 = vld [vmem:[%s1569_s16 + $0x10] sm:$0xff]  ;;  %v379_v48 = vld [vmem:[%s1569_s16 + $0xa0] sm:$0xff] }
  0x24   : > { %463 = vperm.xlu0 %1388, %v373_v13   ;;  %v378_v46 = vld [vmem:[%s1569_s16 + $0x98] sm:$0xff]  ;;  %v331_v49 = vld [vmem:[%s2140_s2 + $0x40] sm:$0xff]  ;;  %v352_v50 = vld [vmem:[%s2140_s2 + $0xe8] sm:$0xff]  ;;  %p1415_p5 = pnand %p1414_p3, %p1410_p0 }
  0x25   : > { %v359_v51 = vld [vmem:[%s1569_s16] sm:$0xff]  ;;  %v377_v52 = vld [vmem:[%s1569_s16 + $0x90] sm:$0xff]  ;;  %v360_v53 = vld [vmem:[%s1569_s16 + $0x8] sm:$0xff] }
  0x26   : > { %v332_v54 = vld [vmem:[%s2140_s2 + $0x48] sm:$0xff]  ;;  %v353_v55 = vld [vmem:[%s2140_s2 + $0xf0] sm:$0xff]  ;;  %v375_v56 = vld [vmem:[%s1569_s16 + $0x80] sm:$0xff] }
  0x27   : > { %v376_v57 = vld [vmem:[%s1569_s16 + $0x88] sm:$0xff]  ;;  %v333_v58 = vld [vmem:[%s2140_s2 + $0x50] sm:$0xff]  ;;  %v354_v59 = vld [vmem:[%s2140_s2 + $0xf8] sm:$0xff] }
  0x28   : > { %1254 = vmatmul.msk.f32.gmra.mxu0 %vm551_vm1, %v324_v14  ;;  %1275 = vmatmul.msk.f32.gmra.mxu2 %vm551_vm1, %v345_v15  ;;  %v955_v60 = vld [vmem:[%s2142_s4 + $0x10] sm:$0xff]  ;;  %v954_v61 = vld [vmem:[%s2142_s4 + $0x8] sm:$0xff]  ;;  %v334_v62 = vld [vmem:[%s2140_s2 + $0x58] sm:$0xff] }
  0x29   : > { %1287 = vmatmul.msk.f32.gmra.mxu1 %vm551_vm1, %v324_v14  ;;  %v953_v0 = vld [vmem:[%s2142_s4] sm:$0xff]  ;;  %v956_v2 = vld [vmem:[%s2142_s4 + $0x18] sm:$0xff]  ;;  %v336_v4 = vld [vmem:[%s2140_s2 + $0x68] sm:$0xff] }
  0x2a   : > { %1307 = vmatmul.msk.f32.gmra.mxu3 %vm551_vm1, %v344_v9  ;;  %v335_v1 = vld [vmem:[%s2140_s2 + $0x60] sm:$0xff]  ;;  %v337_v6 = vld [vmem:[%s2140_s2 + $0x70] sm:$0xff]  ;;  %v338_v11 = vld [vmem:[%s2140_s2 + $0x78] sm:$0xff] }
  0x2b   : > { %533 = vperm.xlu2 %1390, %v387_v16   ;;  %448 = vperm.xlu1 %1389, %v370_v17   ;;  %v339_v16 = vld [vmem:[%s2140_s2 + $0x80] sm:$0xff] }
  0x2c   : > { %538 = vperm.xlu0 %1388, %v388_v18  }
  0x30   : > { %1255 = vmatmul.msk.f32.gmra.mxu0 %vm551_vm1, %v325_v19  ;;  %1276 = vmatmul.msk.f32.gmra.mxu2 %vm551_vm1, %v346_v20 }
  0x31   : > { %1288 = vmatmul.msk.f32.gmra.mxu1 %vm551_vm1, %v325_v19 }
  0x32   : > { %1308 = vmatmul.msk.f32.gmra.mxu3 %vm551_vm1, %v345_v15 }
  0x33   : > { %528 = vperm.xlu1 %1389, %v386_v21   ;;  %438 = vperm.xlu2 %1390, %v368_v22  }
  0x34   : > { %443 = vperm.xlu0 %1388, %v369_v23   ;;  %v340_v23 = vld [vmem:[%s2140_s2 + $0x88] sm:$0xff] }
  0x38   : > { %1256 = vmatmul.msk.f32.gmra.mxu0 %vm551_vm1, %v326_v24  ;;  %1277 = vmatmul.msk.f32.gmra.mxu2 %vm551_vm1, %v347_v25 }
  0x39   : > { %1289 = vmatmul.msk.f32.gmra.mxu1 %vm551_vm1, %v326_v24 }
  0x3a   : > { %1309 = vmatmul.msk.f32.gmra.mxu3 %vm551_vm1, %v346_v20 }
  0x3b   : > { %518 = vperm.xlu2 %1390, %v384_v26   ;;  %433 = vperm.xlu1 %1389, %v367_v27  }
  0x3c   : > { %523 = vperm.xlu0 %1388, %v385_v28  }
  0x40   : > { %1257 = vmatmul.msk.f32.gmra.mxu0 %vm551_vm1, %v327_v29  ;;  %1278 = vmatmul.msk.f32.gmra.mxu2 %vm551_vm1, %v348_v30 }
  0x41   : > { %1290 = vmatmul.msk.f32.gmra.mxu1 %vm551_vm1, %v327_v29 }
  0x42   : > { %1310 = vmatmul.msk.f32.gmra.mxu3 %vm551_vm1, %v347_v25 }
  0x43   : > { %513 = vperm.xlu1 %1389, %v383_v31   ;;  %423 = vperm.xlu2 %1390, %v365_v32   ;;  %v341_v31 = vld [vmem:[%s2140_s2 + $0x90] sm:$0xff] }
  0x44   : > { %428 = vperm.xlu0 %1388, %v366_v33  }
  0x48   : > { %1258 = vmatmul.msk.f32.gmra.mxu0 %vm551_vm1, %v328_v34  ;;  %1279 = vmatmul.msk.f32.gmra.mxu2 %vm551_vm1, %v349_v35 }
  0x49   : > { %1291 = vmatmul.msk.f32.gmra.mxu1 %vm551_vm1, %v328_v34 }
  0x4a   : > { %1311 = vmatmul.msk.f32.gmra.mxu3 %vm551_vm1, %v348_v30 }
  0x4b   : > { %503 = vperm.xlu2 %1390, %v381_v36   ;;  %418 = vperm.xlu1 %1389, %v364_v37  }
  0x4c   : > { %508 = vperm.xlu0 %1388, %v382_v38   ;;  %v342_v38 = vld [vmem:[%s2140_s2 + $0x98] sm:$0xff] }
  0x50   : > { %1259 = vmatmul.msk.f32.gmra.mxu0 %vm551_vm1, %v329_v39  ;;  %1280 = vmatmul.msk.f32.gmra.mxu2 %vm551_vm1, %v350_v40 }
  0x51   : > { %1292 = vmatmul.msk.f32.gmra.mxu1 %vm551_vm1, %v329_v39 }
  0x52   : > { %1312 = vmatmul.msk.f32.gmra.mxu3 %vm551_vm1, %v349_v35 }
  0x53   : > { %498 = vperm.xlu1 %1389, %v380_v41   ;;  %408 = vperm.xlu2 %1390, %v362_v42  }
  0x54   : > { %413 = vperm.xlu0 %1388, %v363_v43  }
  0x58   : > { %1260 = vmatmul.msk.f32.gmra.mxu0 %vm551_vm1, %v330_v44  ;;  %1281 = vmatmul.msk.f32.gmra.mxu2 %vm551_vm1, %v351_v45 }
  0x59   : > { %1293 = vmatmul.msk.f32.gmra.mxu1 %vm551_vm1, %v330_v44 }
  0x5a   : > { %1313 = vmatmul.msk.f32.gmra.mxu3 %vm551_vm1, %v350_v40 }
  0x5b   : > { %488 = vperm.xlu2 %1390, %v378_v46   ;;  %403 = vperm.xlu1 %1389, %v361_v47  }
  0x5c   : > { %493 = vperm.xlu0 %1388, %v379_v48  }
  0x60   : > { %1261 = vmatmul.msk.f32.gmra.mxu0 %vm551_vm1, %v331_v49  ;;  %1282 = vmatmul.msk.f32.gmra.mxu2 %vm551_vm1, %v352_v50 }
  0x61   : > { %1294 = vmatmul.msk.f32.gmra.mxu1 %vm551_vm1, %v331_v49 }
  0x62   : > { %1314 = vmatmul.msk.f32.gmra.mxu3 %vm551_vm1, %v351_v45 }
  0x63   : > { %393 = vperm.xlu2 %1390, %v359_v51   ;;  %483 = vperm.xlu1 %1389, %v377_v52  }
  0x64   : > { %398 = vperm.xlu0 %1388, %v360_v53  }
  0x68   : > { %1262 = vmatmul.msk.f32.gmra.mxu0 %vm551_vm1, %v332_v54  ;;  %1283 = vmatmul.msk.f32.gmra.mxu2 %vm551_vm1, %v353_v55 }
  0x69   : > { %1295 = vmatmul.msk.f32.gmra.mxu1 %vm551_vm1, %v332_v54 }
  0x6a   : > { %1315 = vmatmul.msk.f32.gmra.mxu3 %vm551_vm1, %v352_v50 }
  0x6b   : > { %473 = vperm.xlu1 %1389, %v375_v56   ;;  %959 = vperm.xlu2 %1390, %v953_v0  }
  0x6c   : > { %478 = vperm.xlu0 %1388, %v376_v57  }
  0x70   : > { %1263 = vmatmul.msk.f32.gmra.mxu0 %vm551_vm1, %v333_v58  ;;  %1284 = vmatmul.msk.f32.gmra.mxu2 %vm551_vm1, %v354_v59 }
  0x71   : > { %1296 = vmatmul.msk.f32.gmra.mxu1 %vm551_vm1, %v333_v58 }
  0x72   : > { %1316 = vmatmul.msk.f32.gmra.mxu3 %vm551_vm1, %v353_v55 }
  0x73   : > { %969 = vperm.xlu1 %1389, %v955_v60   ;;  %974 = vperm.xlu2 %1390, %v956_v2  }
  0x74   : > { %964 = vperm.xlu0 %1388, %v954_v61  }
  0x75   : > { %v1737_v63 = vpop.permute.xlu2 %543 }
  0x78   : > { %1264 = vmatmul.msk.f32.gmra.mxu0 %vm551_vm1, %v334_v62 }
  0x79   : > { %1297 = vmatmul.msk.f32.gmra.mxu1 %vm551_vm1, %v334_v62 }
  0x7a   : > { %1317 = vmatmul.msk.f32.gmra.mxu3 %vm551_vm1, %v354_v59 }
  0x7d   : > { %v1751_v3 = vpop.permute.xlu2 %453 }
  0x80   : > { %1265 = vmatmul.msk.f32.gmra.mxu0 %vm551_vm1, %v335_v1 }
  0x81   : > { %1298 = vmatmul.msk.f32.gmra.mxu1 %vm551_vm1, %v335_v1 }
  0x85   : > { %v1763_v7 = vpop.permute.xlu2 %533 }
  0x88   : > { %1266 = vmatmul.msk.f32.gmra.mxu0 %vm551_vm1, %v336_v4 }
  0x89   : > { %1299 = vmatmul.msk.f32.gmra.mxu1 %vm551_vm1, %v336_v4 }
  0x8d   : > { %v1758_v5 = vpop.permute.xlu1 %548  ;;  %v1776_v13 = vpop.permute.xlu2 %438 }
  0x8e   : > { %v1765_v8 = vpop.permute.xlu0 %468 }
  0x90   : > { %1267 = vmatmul.msk.f32.gmra.mxu0 %vm551_vm1, %v337_v6 }
  0x91   : > { %1300 = vmatmul.msk.f32.gmra.mxu1 %vm551_vm1, %v337_v6 }
  0x95   : > { %v1769_v9 = vpop.permute.xlu1 %458  ;;  %v1793_v19 = vpop.permute.xlu2 %518 }
  0x96   : > { %v1774_v12 = vpop.permute.xlu0 %463 }
  0x98   : > { %1268 = vmatmul.msk.f32.gmra.mxu0 %vm551_vm1, %v338_v11 }
  0x99   : > { %1301 = vmatmul.msk.f32.gmra.mxu1 %vm551_vm1, %v338_v11 }
  0x9d   : > { %v1780_v14 = vpop.f32.mrf.mxu0  ;;  %v1782_v15 = vpop.permute.xlu1 %448 }
  0x9e   : > { %v1787_v17 = vpop.f32.mrf.mxu1  ;;  %v1789_v18 = vpop.permute.xlu0 %538 }
  0x9f   : > { %2147 = vst [vmem:[#allocation5_spill] sm:$0xff] %v1787_v17  ;;  %v1814_v28 = vpop.permute.xlu2 %423 }
  0xa0   : > { %1269 = vmatmul.msk.f32.gmra.mxu0 %vm551_vm1, %v339_v16 }
  0xa1   : > { %1302 = vmatmul.msk.f32.gmra.mxu1 %vm551_vm1, %v339_v16 }
  0xa3   : > { %v1795_v20 = vpop.f32.mrf.mxu2 }
  0xa5   : > { %v1797_v21 = vpop.f32.mrf.mxu0  ;;  %v1799_v22 = vpop.permute.xlu1 %528 }
  0xa6   : > { %v1804_v24 = vpop.f32.mrf.mxu1  ;;  %v1806_v25 = vpop.permute.xlu0 %443 }
  0xa7   : > { %2148 = vst [vmem:[#allocation6_spill] sm:$0xff] %v1804_v24  ;;  %v1808_v26 = vpop.f32.mrf.mxu3  ;;  %v1840_v41 = vpop.permute.xlu2 %503 }
  0xa8   : > { %2149 = vst [vmem:[#allocation7_spill] sm:$0xff] %v1808_v26  ;;  %1270 = vmatmul.msk.f32.gmra.mxu0 %vm551_vm1, %v340_v23 }
  0xa9   : > { %1303 = vmatmul.msk.f32.gmra.mxu1 %vm551_vm1, %v340_v23 }
  0xab   : > { %v1812_v27 = vpop.f32.mrf.mxu2 }
  0xad   : > { %v1816_v29 = vpop.f32.mrf.mxu0  ;;  %v1818_v30 = vpop.permute.xlu1 %433 }
  0xae   : > { %v1823_v32 = vpop.f32.mrf.mxu1  ;;  %v1825_v33 = vpop.permute.xlu0 %523 }
  0xaf   : > { %2150 = vst [vmem:[#allocation8_spill] sm:$0xff] %v1823_v32  ;;  %v848_v34 = vpop.f32.mrf.mxu3 }
  0xb0   : > { %1271 = vmatmul.msk.f32.gmra.mxu0 %vm551_vm1, %v341_v31 }
  0xb1   : > { %1304 = vmatmul.msk.f32.gmra.mxu1 %vm551_vm1, %v341_v31 }
  0xb3   : > { %v1829_v35 = vpop.f32.mrf.mxu2 }
  0xb5   : > { %v1831_v36 = vpop.f32.mrf.mxu0  ;;  %v514_v37 = vpop.permute.xlu1 %513 }
  0xb6   : > { %v1836_v39 = vpop.f32.mrf.mxu1  ;;  %v1838_v40 = vpop.permute.xlu0 %428 }
  0xb7   : > { %v851_v42 = vpop.f32.mrf.mxu3 }
  0xb8   : > { %1272 = vmatmul.msk.f32.gmra.mxu0 %vm551_vm1, %v342_v38  ;;  %v1844_v43 = vadd.f32 %v851_v42, %v1840_v41 }
  0xb9   : > { %1305 = vmatmul.msk.f32.gmra.mxu1 %vm551_vm1, %v342_v38 }
  0xba   : > { %2151 = vst [vmem:[#allocation9_spill] sm:$0xff] %v1844_v43 }
  0xbb   : > { %v744_v44 = vpop.f32.mrf.mxu2 }
  0xbd   : > { %v1847_v45 = vpop.f32.mrf.mxu0  ;;  %v1849_v46 = vpop.permute.xlu1 %418 }
  0xbe   : > { %v1851_v47 = vpop.f32.mrf.mxu1  ;;  %v509_v48 = vpop.permute.xlu0 %508 }
  0xbf   : > { %v854_v49 = vpop.f32.mrf.mxu3 }
  0xc0   : > { %1273 = vmatmul.msk.f32.gmra.mxu0 %vm551_vm1, %v1590_v10  ;;  %v1855_v50 = vadd.f32 %v854_v49, %v509_v48 }
  0xc2   : > { %2152 = vst [vmem:[#allocation10_spill] sm:$0xff] %v1855_v50 }
  0xc3   : > { %v747_v51 = vpop.f32.mrf.mxu2 }
  0xc5   : > { %v1857_v52 = vpop.f32.mrf.mxu0  ;;  %v499_v53 = vpop.permute.xlu1 %498 }
  0xc6   : > { %v800_v54 = vpop.f32.mrf.mxu1  ;;  %v1859_v55 = vadd.f32 %v848_v34, %v499_v53 }
  0xc7   : > { %v1862_v56 = vadd.f32 %v800_v54, %v1849_v46  ;;  %v857_v57 = vpop.f32.mrf.mxu3 }
  0xc8   : > { %2153 = vst [vmem:[#allocation11_spill] sm:$0xff] %v1859_v55  ;;  %v1864_v58 = vadd.f32 %v857_v57, %v514_v37 }
  0xca   : > { %2154 = vst [vmem:[#allocation12_spill] sm:$0xff] %v1864_v58 }
  0xcb   : > { %v750_v59 = vpop.f32.mrf.mxu2 }
  0xcd   : > { %v1866_v60 = vpop.f32.mrf.mxu0 }
  0xce   : > { %v803_v61 = vpop.f32.mrf.mxu1 }
  0xcf   : > { %v1869_v10 = vadd.f32 %v803_v61, %v1814_v28 }
  0xd3   : > { %v753_v62 = vpop.f32.mrf.mxu2 }
  0xd4   : > { %v754_v43 = vadd.f32 %v753_v62, %v1799_v22 }
  0xd5   : > { %v1871_v0 = vpop.f32.mrf.mxu0 }
  0xd6   : > { %v806_v1 = vpop.f32.mrf.mxu1  ;;  %v935_v24 = vmax.f32 %v754_v43, 0.0 }
  0xd7   : > { %v1874_v2 = vadd.f32 %v806_v1, %v1838_v40 }
  0xdb   : > { %v756_v4 = vpop.f32.mrf.mxu2 }
  0xdc   : > { %v757_v1 = vadd.f32 %v756_v4, %v1763_v7  ;;  %v745_v4 = vadd.f32 %v744_v44, %v514_v37 }
  0xdd   : > { %v1876_v6 = vpop.f32.mrf.mxu0 }
  0xde   : > { %v809_v11 = vpop.f32.mrf.mxu1  ;;  %v937_v50 = vmax.f32 %v757_v1, 0.0  ;;  %v1909_v1 = vpop.permute.xlu0 %413 }
  0xdf   : > { %v1879_v16 = vadd.f32 %v809_v11, %v1818_v30 }
  0xe3   : > { %v759_v23 = vpop.f32.mrf.mxu2 }
  0xe4   : > { %v760_v55 = vadd.f32 %v759_v23, %v1789_v18 }
  0xe5   : > { %v1881_v31 = vpop.f32.mrf.mxu0 }
  0xe6   : > { %v1885_v57 = vpop.f32.mrf.mxu1  ;;  %v939_v58 = vmax.f32 %v760_v55, 0.0  ;;  %v929_v55 = vmax.f32 %v745_v4, 0.0 }
  0xeb   : > { %v762_v34 = vpop.f32.mrf.mxu2 }
  0xec   : > { %v763_v42 = vadd.f32 %v762_v34, %v1737_v63  ;;  %v751_v34 = vadd.f32 %v750_v59, %v1825_v33  ;;  %v736_v59 = vadd.f32 %v1795_v20, %v499_v53 }
  0xed   : > { %v702_v38 = vpop.f32.mrf.mxu0 }
  0xee   : > { %v941_v26 = vmax.f32 %v763_v42, 0.0  ;;  %v1892_v32 = vpop.f32.mrf.mxu1  ;;  %v933_v23 = vmax.f32 %v751_v34, 0.0  ;;  %v742_v42 = vadd.f32 %v1829_v35, %v509_v48 }
  0xf0   : > { %v927_v43 = vmax.f32 %v742_v42, 0.0 }
  0xf3   : > { %v765_v49 = vpop.f32.mrf.mxu2 }
  0xf4   : > { %v766_v54 = vadd.f32 %v765_v49, %v1758_v5  ;;  %v748_v49 = vadd.f32 %v747_v51, %v1793_v19 }
  0xf5   : > { %v705_v61 = vpop.f32.mrf.mxu0 }
  0xf6   : > { %v943_v11 = vmax.f32 %v766_v54, 0.0  ;;  %v931_v54 = vmax.f32 %v748_v49, 0.0  ;;  %v1900_v37 = vpop.f32.mrf.mxu1 }
  0xf8   : > { %1006 = vmatpush.msrb.mxu3 %v943_v11  ;;  %v1911_v11 = vpop.permute.xlu2 %408 }
  0xfa   : > { %1007 = vmatpush.msrb.mxu3 %v941_v26  ;;  %v739_v26 = vadd.f32 %v1812_v27, %v1840_v41 }
  0xfc   : > { %1008 = vmatpush.msrb.mxu3 %v939_v58  ;;  %v925_v51 = vmax.f32 %v739_v26, 0.0 }
  0xfd   : > { %v708_v17 = vpop.f32.mrf.mxu0 }
  0xfe   : > { %1009 = vmatpush.msrb.mxu3 %v937_v50  ;;  %v1898_v50 = vpop.f32.mrf.mxu3  ;;  %v1904_v27 = vpop.f32.mrf.mxu1  ;;  %v709_v34 = vadd.f32 %v708_v17, %v1751_v3  ;;  %v697_v17 = vadd.f32 %v1876_v6, %v1818_v30  ;;  %v688_v6 = vadd.f32 %v1857_v52, %v1849_v46 }
 0x100   : > { %1010 = vmatpush.msrb.mxu3 %v935_v24  ;;  %v923_v24 = vmax.f32 %v736_v59, 0.0  ;;  %v700_v59 = vadd.f32 %v1881_v31, %v1776_v13  ;;  %v691_v31 = vadd.f32 %v1866_v60, %v1814_v28 }
 0x102   : > { %1011 = vmatpush.msrb.mxu3 %v933_v23  ;;  %v706_v23 = vadd.f32 %v705_v61, %v1782_v15  ;;  %v1924_v61 = vpop.permute.xlu0 %493 }
 0x104   : > { %1012 = vmatpush.msrb.mxu3 %v931_v54 }
 0x105   : > { %v711_v58 = vpop.f32.mrf.mxu0 }
 0x106   : > { %1013 = vmatpush.msrb.mxu3 %v929_v55  ;;  %v1902_v44 = vpop.f32.mrf.mxu3  ;;  %v712_v53 = vadd.f32 %v711_v58, %v1769_v9  ;;  %v824_v54 = vpop.f32.mrf.mxu1  ;;  %v703_v55 = vadd.f32 %v702_v38, %v1806_v25  ;;  %v905_v58 = vmax.f32 %v709_v34, 0.0  ;;  %v899_v38 = vmax.f32 %v700_v59, 0.0 }
 0x107   : > { %v682_v34 = vadd.f32 %v1831_v36, %v1911_v11 }
 0x108   : > { %1014 = vmatpush.msrb.mxu3 %v927_v43  ;;  %v907_v42 = vmax.f32 %v712_v53, 0.0  ;;  %v903_v43 = vmax.f32 %v706_v23, 0.0 }
 0x10a   : > { %1015 = vmatpush.msrb.mxu3 %v925_v51  ;;  %v901_v51 = vmax.f32 %v703_v55, 0.0  ;;  %v1944_v28 = vpop.permute.xlu0 %398 }
 0x10b   : > { %v676_v55 = vadd.f32 %v1797_v21, %v1944_v28  ;;  %v1961_v21 = vld [vmem:[%s2141_s3] sm:$0xff] }
 0x10c   : > { %1016 = vmatpush.msrb.mxu3 %v923_v24  ;;  %v1926_v24 = vpop.permute.xlu2 %488 }
 0x10d   : > { %v714_v35 = vpop.f32.mrf.mxu0 }
 0x10e   : > { %v715_v48 = vadd.f32 %v714_v35, %v1774_v12  ;;  %v1914_v4 = vpop.f32.mrf.mxu3  ;;  %v694_v35 = vadd.f32 %v1871_v0, %v1838_v40  ;;  %v827_v30 = vpop.f32.mrf.mxu1  ;;  %v685_v40 = vadd.f32 %v1847_v45, %v1909_v1  ;;  %v893_v0 = vmax.f32 %v691_v31, 0.0 }
 0x110   : > { %v909_v49 = vmax.f32 %v715_v48, 0.0  ;;  %v895_v53 = vmax.f32 %v694_v35, 0.0  ;;  %v889_v52 = vmax.f32 %v685_v40, 0.0 }
 0x114   : > { %v1948_v23 = vpop.permute.xlu2 %393 }
 0x115   : > { %v717_v41 = vpop.f32.mrf.mxu0 }
 0x116   : > { %v718_v20 = vadd.f32 %v717_v41, %v1765_v8  ;;  %v1930_v41 = vpop.f32.mrf.mxu3  ;;  %v830_v36 = vpop.f32.mrf.mxu1 }
 0x118   : > { %v911_v62 = vmax.f32 %v718_v20, 0.0  ;;  %v897_v20 = vmax.f32 %v697_v17, 0.0 }
 0x11a   : > { %977 = vmatpush.msrb.mxu2 %v911_v62  ;;  %v1940_v62 = vpop.permute.xlu1 %403 }
 0x11b   : > { %v679_v46 = vadd.f32 %v1816_v29, %v1940_v62  ;;  %v883_v29 = vmax.f32 %v676_v55, 0.0 }
 0x11c   : > { %978 = vmatpush.msrb.mxu2 %v909_v49  ;;  %v891_v49 = vmax.f32 %v688_v6, 0.0 }
 0x11d   : > { %v1917_v26 = vpop.f32.mrf.mxu0  ;;  %v885_v59 = vmax.f32 %v679_v46, 0.0 }
 0x11e   : > { %979 = vmatpush.msrb.mxu2 %v907_v42  ;;  %v1950_v45 = vpop.f32.mrf.mxu3  ;;  %v887_v42 = vmax.f32 %v682_v34, 0.0 }
 0x120   : > { %980 = vmatpush.msrb.mxu2 %v905_v58  ;;  %v673_v58 = vadd.f32 %v1780_v14, %v1948_v23 }
 0x122   : > { %981 = vmatpush.msrb.mxu2 %v903_v43  ;;  %v831_v43 = vadd.f32 %v830_v36, %v1765_v8  ;;  %v881_v35 = vmax.f32 %v673_v58, 0.0  ;;  %v1964_v14 = vpop.permute.xlu1 %483  ;;  %v822_v8 = vadd.f32 %v1904_v27, %v1751_v3  ;;  %v1980_v3 = vld [vmem:[%s2141_s3 + $0x10] sm:$0xff]  ;;  %v898_v36 = vmax.f32 %v1879_v16, 0.0 }
 0x123   : > { %v798_v16 = vadd.f32 %v1851_v47, %v1909_v1  ;;  %v867_v1 = vadd.f32 %v1914_v4, %v1799_v22  ;;  %v948_v22 = vld [vmem:[%s2141_s3 + $0x18] sm:$0xff] }
 0x124   : > { %982 = vmatpush.msrb.mxu2 %v901_v51  ;;  %v828_v51 = vadd.f32 %v827_v30, %v1774_v12  ;;  %v912_v31 = vmax.f32 %v831_v43, 0.0  ;;  %v819_v30 = vadd.f32 %v1900_v37, %v1782_v15  ;;  %v906_v40 = vmax.f32 %v822_v8, 0.0 }
 0x125   : > { %v1932_v48 = vpop.f32.mrf.mxu0  ;;  %v813_v15 = vadd.f32 %v1885_v57, %v1776_v13  ;;  %v890_v47 = vmax.f32 %v798_v16, 0.0  ;;  %v1095_v16 = vld [vmem:[%s2143_s5 + $0x10] sm:$0xff] }
 0x126   : > { %983 = vmatpush.msrb.mxu2 %v899_v38  ;;  %v825_v38 = vadd.f32 %v824_v54, %v1769_v9  ;;  %v910_v12 = vmax.f32 %v828_v51, 0.0  ;;  %v816_v54 = vadd.f32 %v1892_v32, %v1806_v25  ;;  %v904_v37 = vmax.f32 %v819_v30, 0.0  ;;  %v1985_v25 = vpop.permute.xlu0 %478 }
 0x127   : > { %v724_v46 = vadd.f32 %v1932_v48, %v1985_v25  ;;  %v900_v13 = vmax.f32 %v813_v15, 0.0  ;;  %v1999_v48 = vld [vmem:[%s2141_s3 + $0x20] sm:$0xff]  ;;  %v894_v51 = vmax.f32 %v1869_v10, 0.0  ;;  %v2155_v10 = vld [vmem:[#allocation8_spill] sm:$0xff] }
 0x128   : > { %984 = vmatpush.msrb.mxu2 %v897_v20  ;;  %v875_v20 = vpop.f32.mrf.mxu3  ;;  %v908_v6 = vmax.f32 %v825_v38, 0.0  ;;  %v902_v32 = vmax.f32 %v816_v54, 0.0  ;;  %v892_v38 = vmax.f32 %v1862_v56, 0.0  ;;  %v2160_v15 = vld [vmem:[#allocation9_spill] sm:$0xff] }
 0x12a   : > { %985 = vmatpush.msrb.mxu2 %v895_v53  ;;  %v1971_v53 = vpop.f32.mrf.mxu1 }
 0x12c   : > { %986 = vmatpush.msrb.mxu2 %v893_v0 }
 0x12d   : > { %v726_v60 = vpop.f32.mrf.mxu0 }
 0x12e   : > { %987 = vmatpush.msrb.mxu2 %v891_v49  ;;  %v727_v27 = vadd.f32 %v726_v60, %v1964_v14 }
 0x130   : > { %988 = vmatpush.msrb.mxu2 %v889_v52  ;;  %v878_v55 = vpop.f32.mrf.mxu3  ;;  %v917_v60 = vmax.f32 %v727_v27, 0.0  ;;  %v2161_v27 = vld [vmem:[#allocation7_spill] sm:$0xff] }
 0x131   : > { %v879_v58 = vadd.f32 %v878_v55, %v1758_v5  ;;  %v2008_v5 = vld [vmem:[%s2141_s3 + $0x8] sm:$0xff] }
 0x132   : > { %989 = vmatpush.msrb.mxu2 %v887_v42  ;;  %v1990_v42 = vpop.permute.xlu1 %473  ;;  %v2001_v43 = vpop.f32.mrf.mxu1 }
 0x133   : > { %v721_v57 = vadd.f32 %v1917_v26, %v1990_v42  ;;  %v876_v26 = vadd.f32 %v875_v20, %v1737_v63  ;;  %v795_v63 = vadd.f32 %v1836_v39, %v1911_v11  ;;  %v951_v39 = vld [vmem:[%s2141_s3 + $0x30] sm:$0xff] }
 0x134   : > { %990 = vmatpush.msrb.mxu2 %v885_v59  ;;  %v915_v59 = vmax.f32 %v724_v46, 0.0 }
 0x135   : > { %v729_v17 = vpop.f32.mrf.mxu0  ;;  %v942_v20 = vmax.f32 %v876_v26, 0.0  ;;  %v888_v56 = vmax.f32 %v795_v63, 0.0  ;;  %v965_v26 = vpop.permute.xlu0 %964 }
 0x136   : > { %991 = vmatpush.msrb.mxu2 %v883_v29  ;;  %v730_v0 = vadd.f32 %v729_v17, %v1926_v24  ;;  %v896_v29 = vmax.f32 %v1874_v2, 0.0  ;;  %v913_v17 = vmax.f32 %v721_v57, 0.0  ;;  %v873_v2 = vadd.f32 %v1950_v45, %v1789_v18 }
 0x137   : > { %v792_v18 = vadd.f32 %v2155_v10, %v1940_v62  ;;  %v2157_v62 = vld [vmem:[#allocation5_spill] sm:$0xff]  ;;  %v837_v57 = vadd.f32 %v2001_v43, %v1985_v25 }
 0x138   : > { %992 = vmatpush.msrb.mxu2 %v881_v35  ;;  %v919_v52 = vmax.f32 %v730_v0, 0.0  ;;  %v944_v35 = vmax.f32 %v879_v58, 0.0  ;;  %v940_v45 = vmax.f32 %v873_v2, 0.0 }
 0x139   : > { %993 = vmatmul.f32.vlgmr.msrb.gmra.mxu2 %v1961_v21  ;;  %v886_v30 = vmax.f32 %v792_v18, 0.0 }
 0x13a   : > { %1035 = vmatpush.msra.mxu2 %v912_v31  ;;  %v870_v31 = vadd.f32 %v1930_v41, %v1763_v7  ;;  %v2156_v7 = vld [vmem:[#allocation6_spill] sm:$0xff]  ;;  %v864_v41 = vadd.f32 %v1902_v44, %v1825_v33  ;;  %v839_v4 = vpop.f32.mrf.mxu1  ;;  %v970_v63 = vpop.permute.xlu1 %969 }
 0x13b   : > { %v789_v11 = vadd.f32 %v2156_v7, %v1944_v28  ;;  %v936_v28 = vmax.f32 %v867_v1, 0.0 }
 0x13c   : > { %1036 = vmatpush.msra.mxu2 %v910_v12  ;;  %v938_v8 = vmax.f32 %v870_v31, 0.0  ;;  %v786_v12 = vadd.f32 %v2157_v62, %v1948_v23  ;;  %v934_v44 = vmax.f32 %v864_v41, 0.0 }
 0x13d   : > { %v732_v9 = vpop.f32.mrf.mxu0  ;;  %v884_v33 = vmax.f32 %v789_v11, 0.0 }
 0x13e   : > { %v733_v34 = vadd.f32 %v732_v9, %v1924_v61  ;;  %1037 = vmatpush.msra.mxu2 %v908_v6  ;;  %v861_v6 = vadd.f32 %v1898_v50, %v1793_v19  ;;  %v882_v9 = vmax.f32 %v786_v12, 0.0  ;;  %v950_v19 = vld [vmem:[%s2141_s3 + $0x28] sm:$0xff] }
 0x13f   : > { %v2159_v50 = vld [vmem:[#allocation10_spill] sm:$0xff] }
 0x140   : > { %v921_v49 = vmax.f32 %v733_v34, 0.0  ;;  %1038 = vmatpush.msra.mxu2 %v906_v40  ;;  %v932_v54 = vmax.f32 %v861_v6, 0.0  ;;  %v2158_v40 = vld [vmem:[#allocation12_spill] sm:$0xff]  ;;  %v928_v23 = vmax.f32 %v2159_v50, 0.0 }
 0x141   : > { %996 = vmatmul.f32.gmra.mxu2 %v1980_v3  ;;  %v930_v0 = vmax.f32 %v2158_v40, 0.0 }
 0x142   : > { %1039 = vmatpush.msra.mxu2 %v904_v37  ;;  %1017 = vmatpush.msrb.mxu3 %v921_v49  ;;  %v842_v34 = vpop.f32.mrf.mxu1  ;;  %v926_v37 = vmax.f32 %v2160_v15, 0.0  ;;  %v846_v49 = vadd.f32 %v2161_v27, %v1924_v61 }
 0x144   : > { %1040 = vmatpush.msra.mxu2 %v902_v32  ;;  %1018 = vmatpush.msrb.mxu3 %v919_v52  ;;  %v2162_v32 = vld [vmem:[#allocation11_spill] sm:$0xff]  ;;  %v843_v52 = vadd.f32 %v842_v34, %v1926_v24  ;;  %v922_v55 = vmax.f32 %v846_v49, 0.0  ;;  %v834_v24 = vadd.f32 %v1971_v53, %v1990_v42  ;;  %v960_v53 = vpop.permute.xlu2 %959 }
 0x145   : > { %v924_v46 = vmax.f32 %v2162_v32, 0.0 }
 0x146   : > { %1041 = vmatpush.msra.mxu2 %v900_v13  ;;  %1019 = vmatpush.msrb.mxu3 %v917_v60  ;;  %v840_v13 = vadd.f32 %v839_v4, %v1964_v14  ;;  %v920_v61 = vmax.f32 %v843_v52, 0.0  ;;  %v916_v14 = vmax.f32 %v837_v57, 0.0  ;;  %v1094_v4 = vld [vmem:[%s2143_s5 + $0x8] sm:$0xff] }
 0x148   : > { %1042 = vmatpush.msra.mxu2 %v898_v36  ;;  %1020 = vmatpush.msrb.mxu3 %v915_v59  ;;  %v918_v60 = vmax.f32 %v840_v13, 0.0  ;;  %v914_v36 = vmax.f32 %v834_v24, 0.0  ;;  %v1093_v59 = vld [vmem:[%s2143_s5] sm:$0xff] }
 0x149   : > { %999 = vmatmul.f32.gmra.mxu2 %v1999_v48 }
 0x14a   : > { %1043 = vmatpush.msra.mxu2 %v896_v29  ;;  %1021 = vmatpush.msrb.mxu3 %v913_v17 }
 0x14b   : > { %1022 = vmatmul.f32.vlgmr.msrb.gmra.mxu3 %v2008_v5 }
 0x14c   : > { %1044 = vmatpush.msra.mxu2 %v894_v51  ;;  %1064 = vmatpush.msra.mxu3 %v944_v35  ;;  %v975_v18 = vpop.permute.xlu2 %974 }
 0x14e   : > { %1045 = vmatpush.msra.mxu2 %v892_v38  ;;  %1065 = vmatpush.msra.mxu3 %v942_v20  ;;  %v1097_v20 = vld [vmem:[%s2143_s5 + $0x20] sm:$0xff] }
 0x150   : > { %1046 = vmatpush.msra.mxu2 %v890_v47  ;;  %1066 = vmatpush.msra.mxu3 %v940_v45 }
 0x151   : > { %1002 = vmatmul.f32.gmra.mxu2 %v951_v39 }
 0x152   : > { %1047 = vmatpush.msra.mxu2 %v888_v56  ;;  %1067 = vmatpush.msra.mxu3 %v938_v8  ;;  %v1099_v56 = vld [vmem:[%s2143_s5 + $0x30] sm:$0xff] }
 0x153   : > { %1025 = vmatmul.f32.gmra.mxu3 %v948_v22 }
 0x154   : > { %1048 = vmatpush.msra.mxu2 %v886_v30  ;;  %1068 = vmatpush.msra.mxu3 %v936_v28  ;;  %v1096_v28 = vld [vmem:[%s2143_s5 + $0x18] sm:$0xff] }
 0x156   : > { %1049 = vmatpush.msra.mxu2 %v884_v33  ;;  %1069 = vmatpush.msra.mxu3 %v934_v44 }
 0x158   : > { %1050 = vmatpush.msra.mxu2 %v882_v9  ;;  %1070 = vmatpush.msra.mxu3 %v932_v54 }
 0x159   : > { %1051 = vmatmul.f32.vlgmr.msra.gmra.mxu2 %v1961_v21  ;;  %v952_v21 = vld [vmem:[%s2141_s3 + $0x38] sm:$0xff] }
 0x15a   : > { %1071 = vmatpush.msra.mxu3 %v930_v0  ;;  %v1098_v0 = vld [vmem:[%s2143_s5 + $0x28] sm:$0xff] }
 0x15b   : > { %1028 = vmatmul.f32.gmra.mxu3 %v950_v19 }
 0x15c   : > { %1072 = vmatpush.msra.mxu3 %v928_v23 }
 0x15e   : > { %1073 = vmatpush.msra.mxu3 %v926_v37  ;;  %v1100_v37 = vld [vmem:[%s2143_s5 + $0x38] sm:$0xff] }
 0x160   : > { %1074 = vmatpush.msra.mxu3 %v924_v46 }
 0x161   : > { %1054 = vmatmul.f32.gmra.mxu2 %v1980_v3 }
 0x162   : > { %1075 = vmatpush.msra.mxu3 %v922_v55 }
 0x163   : > { %1031 = vmatmul.f32.gmra.mxu3 %v952_v21 }
 0x164   : > { %1076 = vmatpush.msra.mxu3 %v920_v61 }
 0x166   : > { %1077 = vmatpush.msra.mxu3 %v918_v60 }
 0x168   : > { %1078 = vmatpush.msra.mxu3 %v916_v14 }
 0x169   : > { %1057 = vmatmul.f32.gmra.mxu2 %v1999_v48 }
 0x16a   : > { %1079 = vmatpush.msra.mxu3 %v914_v36 }
 0x16b   : > { %1080 = vmatmul.f32.vlgmr.msra.gmra.mxu3 %v2008_v5 }
 0x171   : > { %1060 = vmatmul.f32.gmra.mxu2 %v951_v39 }
 0x173   : > { %1083 = vmatmul.f32.gmra.mxu3 %v948_v22 }
 0x17b   : > { %1086 = vmatmul.f32.gmra.mxu3 %v950_v19 }
 0x183   : > { %1089 = vmatmul.f32.gmra.mxu3 %v952_v21 }
 0x1bc   : > { %v994_v3 = vpop.f32.mrf.mxu2 }
 0x1bd   : > { %v995_v42 = vadd.f32 %v994_v3, %v960_v53 }
 0x1c4   : > { %v997_v25 = vpop.f32.mrf.mxu2 }
 0x1c5   : > { %v998_v17 = vadd.f32 %v997_v25, %v965_v26 }
 0x1cc   : > { %v1000_v43 = vpop.f32.mrf.mxu2 }
 0x1cd   : > { %v1001_v38 = vadd.f32 %v1000_v43, %v970_v63 }
 0x1ce   : > { %v1023_v58 = vpop.f32.mrf.mxu3 }
 0x1cf   : > { %v1024_v48 = vadd.f32 %v1023_v58, %v995_v42 }
 0x1d1   : > { %v1101_v29 = vadd.f32 %v1093_v59, %v1024_v48 }
 0x1d3   : > { %1109 = vst [vmem:[%s2068_s17] sm:$0xff] %v1101_v29 }
 0x1d4   : > { %v1003_v35 = vpop.f32.mrf.mxu2 }
 0x1d5   : > { %v1004_v45 = vadd.f32 %v1003_v35, %v975_v18 }
 0x1d6   : > { %v1026_v5 = vpop.f32.mrf.mxu3 }
 0x1d7   : > { %v1027_v51 = vadd.f32 %v1026_v5, %v998_v17 }
 0x1d9   : > { %v1103_v2 = vadd.f32 %v1095_v16, %v1027_v51 }
 0x1db   : > { %1111 = vst [vmem:[%s2068_s17 + $0x10] sm:$0xff] %v1103_v2 }
 0x1dc   : > { %v1052_v1 = vpop.f32.mrf.mxu2 }
 0x1dd   : > { %v1053_v41 = vadd.f32 %v1052_v1, %v960_v53 }
 0x1de   : > { %v1029_v31 = vpop.f32.mrf.mxu3 }
 0x1df   : > { %v1030_v47 = vadd.f32 %v1029_v31, %v1001_v38 }
 0x1e1   : > { %v1105_v10 = vadd.f32 %v1097_v20, %v1030_v47 }
 0x1e3   : > { %1113 = vst [vmem:[%s2068_s17 + $0x20] sm:$0xff] %v1105_v10 }
 0x1e4   : > { %v1055_v8 = vpop.f32.mrf.mxu2 }
 0x1e5   : > { %v1056_v30 = vadd.f32 %v1055_v8, %v965_v26 }
 0x1e6   : > { %v1032_v39 = vpop.f32.mrf.mxu3 }
 0x1e7   : > { %v1033_v7 = vadd.f32 %v1032_v39, %v1004_v45 }
 0x1e9   : > { %v1107_v11 = vadd.f32 %v1099_v56, %v1033_v7 }
 0x1eb   : > { %1115 = vst [vmem:[%s2068_s17 + $0x30] sm:$0xff] %v1107_v11 }
 0x1ec   : > { %v1058_v44 = vpop.f32.mrf.mxu2 }
 0x1ed   : > { %v1059_v54 = vadd.f32 %v1058_v44, %v970_v63 }
 0x1ee   : > { %v1081_v22 = vpop.f32.mrf.mxu3 }
 0x1ef   : > { %v1082_v62 = vadd.f32 %v1081_v22, %v1053_v41 }
 0x1f1   : > { %v1102_v12 = vadd.f32 %v1094_v4, %v1082_v62 }
 0x1f3   : > { %1110 = vst [vmem:[%s2068_s17 + $0x8] sm:$0xff] %v1102_v12 }
 0x1f4   : > { %v1061_v23 = vpop.f32.mrf.mxu2 }
 0x1f5   : > { %v1062_v34 = vadd.f32 %v1061_v23, %v975_v18 }
 0x1f6   : > { %v1084_v6 = vpop.f32.mrf.mxu3 }
 0x1f7   : > { %v1085_v33 = vadd.f32 %v1084_v6, %v1056_v30 }
 0x1f9   : > { %v1104_v9 = vadd.f32 %v1096_v28, %v1085_v33 }
 0x1fb   : > { %1112 = vst [vmem:[%s2068_s17 + $0x18] sm:$0xff] %v1104_v9 }
 0x1fe   : > { %v1087_v40 = vpop.f32.mrf.mxu3 }
 0x1ff   : > { %v1088_v19 = vadd.f32 %v1087_v40, %v1059_v54 }
 0x201   : > { %v1106_v50 = vadd.f32 %v1098_v0, %v1088_v19 }
 0x203   : > { %1114 = vst [vmem:[%s2068_s17 + $0x28] sm:$0xff] %v1106_v50 }
 0x206   : > { %v1090_v15 = vpop.f32.mrf.mxu3 }
 0x207   : > { %v1091_v27 = vadd.f32 %v1090_v15, %v1062_v34 }
 0x209   : > { %v1108_v49 = vadd.f32 %v1100_v37, %v1091_v27 }
 0x20b   : > { %1116 = vst [vmem:[%s2068_s17 + $0x38] sm:$0xff] %v1108_v49 }
 0x20c   : > { %1418 = shalt.err (!%p1415_p5)
}
 0x20d   : > { %s1472_s13 = smov 256   ;;  %s1473_s17 = smov 16  }
 0x20e   : > { %1330 = dma.vmem_to_hbm [thread:$0]  (%p1549_p4), %s1133_s28, 1024, %s1135_s11, %s1118_s24, %s1472_s13, %s1472_s13, %s1473_s17  }
 0x20f PF: > { %p1336_p6 = scmp.ge.s32.totalorder %s1469_s26, 2  ;;  %s1149_s27 = sand.u32 1, %s1449_s21  }
 0x210   : > { %s1150_s30 = scalar_lea.sflag [#allocation3], %s1149_s27 }
 0x211   : > { %p1333_p7 = pnand %p1336_p6, %p1556_p8 }
 0x213   : > { %p1334_p9 = pneg %p1333_p7 }
 0x215   : > { %1444 = dma.done.wait (%p1334_p9), %s1150_s30, 1024  }
 0x216   : > { %1446 = vsyncadd (%p1334_p9), %s1150_s30, 4294966272  ;;  %s19_s26 = sadd.s32 1, %s1469_s26   ;;  %s2163_s21 = smov %s1453_s22 }
 0x217   : > { %p16_p10 = scmp.ge.s32.totalorder %s19_s26, 4   ;;  %s2164_s22 = smov %s1457_s23 }
 0x218   : > { %s2165_s23 = smov %s1562_s10  ;;  %s2166_s24 = smov %s1465_s25 }
 0x219   : > { %s2167_s25 = smov %s2169_s29  ;;  %18 = sbr.rel (!%p16_p10) target bundleno = 4 (0x4), region = 85 }
 0x21e   :  { %1156 = vsyncpa [#allocation3], 1 }
 0x21f   :  { %1158 = vsyncpa [#allocation3 + $0x1], 1 }

</bundles_post_ra>
